<compile_context>
chip_gen: v5e
topology: v5e:2x2
jax: 0.10.0
libtpu: 0.0.40
codegen_flags: <defaults>
</compile_context>

<pallas_src>
import functools

import jax
import jax.numpy as jnp
from jax.experimental import pallas as pl
from jax.experimental.pallas import tpu as pltpu


def lstm_fc_kernel(x_ref,        # (T, B, D)   time-major input (B % 8 == 0)
                   wih_t_ref,    # (D, 4H)     input->gates weight, cols (i,f,o,2g)
                   whh_t_ref,    # (H, 4H)     hidden->gates weight, cols (i,f,o,2g)
                   b_ref,        # (1, 4H)     combined bias (b_ih+b_hh), (i,f,o,2g)
                   fcw_ref,      # (1, H)      fc weight row
                   fcb_ref,      # (1, 1)      fc bias
                   out_ref):     # (B, 1)      output
    T, B, D = x_ref.shape
    H4 = whh_t_ref.shape[1]
    H = H4 // 4

    # ---- Hoisted input projection: ONE MXU matmul for all timesteps.
    # B is a multiple of 8, so this reshape is a free leading-dim merge.
    x_all = x_ref[...].reshape(T * B, D)
    gi = jnp.dot(x_all, wih_t_ref[...],
                 preferred_element_type=jnp.float32) + b_ref[...]   # (T*B, 4H)

    # Recurrent weight loaded once; reused (value) across all serial steps.
    whh = whh_t_ref[...]                                            # (H, 4H)

    # h0 = c0 = 0 (PyTorch zero init); kept as vreg values, never spilled to VMEM.
    h = jnp.zeros((B, H), jnp.float32)
    c = jnp.zeros((B, H), jnp.float32)

    # ---- Serial recurrence.  T is small & static: fully unrolled so the LLO
    # scheduler sees every iteration.  (Switch to lax.fori_loop(unroll=4..8)
    # with h/c in the carry if T grows to hundreds.)
    for t in range(T):
        gates = gi[t * B:(t + 1) * B, :] + jnp.dot(
            h, whh, preferred_element_type=jnp.float32)             # (B, 4H)
        # Single EUP push for all four gates: sigmoid over the whole vreg.
        # Gate order is (i, f, o, g) with g pre-scaled by 2 in the wrapper,
        # so tanh(g) = 2*sigmoid(2g) - 1 (the fixup is a cheap VPU op).
        s = jax.nn.sigmoid(gates)
        i_g = s[:, 0 * H:1 * H]
        f_g = s[:, 1 * H:2 * H]
        o_g = s[:, 2 * H:3 * H]
        g_g = 2.0 * s[:, 3 * H:4 * H] - 1.0
        c = f_g * c + i_g * g_g
        h = o_g * jnp.tanh(c)                                       # 2nd EUP push

    # ---- fc head (dropout p=0.4 is identity in eval mode):
    # VPU multiply + lane reduce instead of an N=1 MXU matmul.
    out_ref[...] = (
        jnp.sum(h * fcw_ref[...], axis=-1, keepdims=True) + fcb_ref[...]
    )


@functools.partial(jax.jit, static_argnames=("hidden_dim",))
def lstm_model_forward(x, w_ih, w_hh, b_ih, b_hh, fc_w, fc_b, *, hidden_dim):
    """x: (B, T, D) batch_first, matching the PyTorch module. Returns (B, 1)."""
    B, T, D = x.shape
    H = hidden_dim

    # Pad batch up to a multiple of 8 so the in-kernel (T*B, D) reshape stays a
    # free sublane-aligned merge; padded rows are sliced off at the end.
    Bp = ((B + 7) // 8) * 8
    xp = x if Bp == B else jnp.pad(x, ((0, Bp - B), (0, 0), (0, 0)))

    def prep_gates(a):
        # PyTorch gate order (i, f, g, o) -> (i, f, o, 2*g).
        # The 2x on the g columns lets the kernel recover tanh(g) from the same
        # sigmoid push that handles i/f/o (tanh(x) = 2*sigmoid(2x) - 1).
        return jnp.concatenate(
            [a[..., 0:2 * H], a[..., 3 * H:4 * H], 2.0 * a[..., 2 * H:3 * H]],
            axis=-1)

    # Layout plumbing only (static transposes / column permutation / scaling).
    x_tbd = jnp.transpose(xp, (1, 0, 2)).astype(jnp.float32)               # (T, Bp, D)
    wih_t = prep_gates(jnp.transpose(w_ih).astype(jnp.float32))            # (D, 4H)
    whh_t = prep_gates(jnp.transpose(w_hh).astype(jnp.float32))            # (H, 4H)
    b = prep_gates((b_ih + b_hh).astype(jnp.float32).reshape(1, 4 * H))    # (1, 4H)
    fcw = fc_w.reshape(1, H).astype(jnp.float32)                           # (1, H)
    fcb = fc_b.reshape(1, 1).astype(jnp.float32)                           # (1, 1)

    out = pl.pallas_call(
        lstm_fc_kernel,
        out_shape=jax.ShapeDtypeStruct((Bp, 1), jnp.float32),
        in_specs=[pl.BlockSpec(memory_space=pltpu.MemorySpace.VMEM)] * 6,
        out_specs=pl.BlockSpec(memory_space=pltpu.MemorySpace.VMEM),
    )(x_tbd, wih_t, whh_t, b, fcw, fcb)
    return out[:B]


def jax_reference(x, w_ih, w_hh, b_ih, b_hh, fc_w, fc_b, hidden_dim):
    """Pure-JAX reference of the same forward pass (layer 0 only, eval dropout)."""
    B, T, D = x.shape
    H = hidden_dim
    h = jnp.zeros((B, H), jnp.float32)
    c = jnp.zeros((B, H), jnp.float32)
    for t in range(T):
        gates = x[:, t, :] @ w_ih.T + h @ w_hh.T + b_ih + b_hh
        i_g = jax.nn.sigmoid(gates[:, 0 * H:1 * H])
        f_g = jax.nn.sigmoid(gates[:, 1 * H:2 * H])
        g_g = jnp.tanh(gates[:, 2 * H:3 * H])
        o_g = jax.nn.sigmoid(gates[:, 3 * H:4 * H])
        c = f_g * c + i_g * g_g
        h = o_g * jnp.tanh(c)
    return h @ fc_w.T + fc_b


if __name__ == "__main__":
    # Small shapes consistent with the module's forward.
    input_dim = 16     # D
    hidden_dim = 32    # H  (4H = 128 -> gates fill a full lane group)
    n_layers = 2       # layers > 0 never affect the output (hn[0] is used)
    batch = 8          # B
    seq_len = 12       # T

    key = jax.random.PRNGKey(0)
    ks = jax.random.split(key, 8)
    bound = 1.0 / jnp.sqrt(hidden_dim)

    # Deterministic parameter init (shapes match nn.LSTM layer 0 + nn.Linear(H,1)).
    w_ih = jax.random.uniform(ks[0], (4 * hidden_dim, input_dim), jnp.float32, -bound, bound)
    w_hh = jax.random.uniform(ks[1], (4 * hidden_dim, hidden_dim), jnp.float32, -bound, bound)
    b_ih = jax.random.uniform(ks[2], (4 * hidden_dim,), jnp.float32, -bound, bound)
    b_hh = jax.random.uniform(ks[3], (4 * hidden_dim,), jnp.float32, -bound, bound)
    fc_w = jax.random.uniform(ks[4], (1, hidden_dim), jnp.float32, -bound, bound)
    fc_b = jax.random.uniform(ks[5], (1,), jnp.float32, -bound, bound)

    x = jax.random.normal(ks[6], (batch, seq_len, input_dim), jnp.float32)

    out = lstm_model_forward(x, w_ih, w_hh, b_ih, b_hh, fc_w, fc_b,
                             hidden_dim=hidden_dim)
    out = jax.block_until_ready(out)

    ref = jax_reference(x, w_ih, w_hh, b_ih, b_hh, fc_w, fc_b, hidden_dim)
    assert out.shape == (batch, 1)
    # Tolerance slightly above 1e-5: tanh(g) is computed as 2*sigmoid(2g)-1 in
    # the kernel (single-EUP-push gate trick), which differs from jnp.tanh by
    # ~1 ulp per step of the f32 recurrence.
    assert jnp.allclose(out, ref, atol=3e-5, rtol=1e-5), (out, ref)

    print("KERNEL_OK")
</pallas_src>

<mosaic_0001>
module attributes {stable_mosaic.version = 11 : i64} {
  func.func @lstm_fc_kernel(%arg0: memref<12x8x16xf32, #tpu.memory_space<vmem>>, %arg1: memref<16x128xf32, #tpu.memory_space<vmem>>, %arg2: memref<32x128xf32, #tpu.memory_space<vmem>>, %arg3: memref<1x128xf32, #tpu.memory_space<vmem>>, %arg4: memref<1x32xf32, #tpu.memory_space<vmem>>, %arg5: memref<1x1xf32, #tpu.memory_space<vmem>>, %arg6: memref<8x1xf32, #tpu.memory_space<vmem>>) attributes {dimension_semantics = [], scalar_prefetch = 0 : i64, scratch_operands = 0 : i64, tpu.core_type = #tpu.core_type<tc>} {
    %c0 = arith.constant 0 : index
    %c0_0 = arith.constant 0 : index
    %c0_1 = arith.constant 0 : index
    %0 = vector.load %arg0[%c0, %c0_0, %c0_1] : memref<12x8x16xf32, #tpu.memory_space<vmem>>, vector<12x8x16xf32>
    %1 = vector.shape_cast %0 : vector<12x8x16xf32> to vector<96x16xf32>
    %c0_2 = arith.constant 0 : index
    %c0_3 = arith.constant 0 : index
    %2 = vector.load %arg1[%c0_2, %c0_3] : memref<16x128xf32, #tpu.memory_space<vmem>>, vector<16x128xf32>
    %cst = arith.constant dense<0.000000e+00> : vector<96x128xf32>
    %3 = tpu.matmul %1, %2, %cst {dimension_numbers = #tpu.dot_dimension_numbers<[1], [0], [0], [1], [0, 0, 1, 1], [], []>} : vector<96x16xf32>, vector<16x128xf32>, vector<96x128xf32> -> vector<96x128xf32>
    %c0_4 = arith.constant 0 : index
    %c0_5 = arith.constant 0 : index
    %4 = vector.load %arg3[%c0_4, %c0_5] : memref<1x128xf32, #tpu.memory_space<vmem>>, vector<1x128xf32>
    %5 = vector.broadcast %4 : vector<1x128xf32> to vector<96x128xf32>
    %6 = arith.addf %3, %5 : vector<96x128xf32>
    %c0_6 = arith.constant 0 : index
    %c0_7 = arith.constant 0 : index
    %7 = vector.load %arg2[%c0_6, %c0_7] : memref<32x128xf32, #tpu.memory_space<vmem>>, vector<32x128xf32>
    %cst_8 = arith.constant 0.000000e+00 : f32
    %8 = vector.broadcast %cst_8 : f32 to vector<8x32xf32>
    %cst_9 = arith.constant 0.000000e+00 : f32
    %9 = vector.broadcast %cst_9 : f32 to vector<8x32xf32>
    %10 = vector.extract_strided_slice %6 {offsets = [0, 0], sizes = [8, 128], strides = [1, 1]} : vector<96x128xf32> to vector<8x128xf32>
    %cst_10 = arith.constant dense<0.000000e+00> : vector<8x128xf32>
    %11 = tpu.matmul %8, %7, %cst_10 {dimension_numbers = #tpu.dot_dimension_numbers<[1], [0], [0], [1], [0, 0, 1, 1], [], []>} : vector<8x32xf32>, vector<32x128xf32>, vector<8x128xf32> -> vector<8x128xf32>
    %12 = arith.addf %10, %11 : vector<8x128xf32>
    %13 = arith.negf %12 : vector<8x128xf32>
    %14 = math.exp %13 : vector<8x128xf32>
    %cst_11 = arith.constant 1.000000e+00 : f32
    %15 = vector.broadcast %cst_11 : f32 to vector<8x128xf32>
    %16 = arith.addf %15, %14 : vector<8x128xf32>
    %17 = arith.divf %15, %16 : vector<8x128xf32>
    %18 = vector.extract_strided_slice %17 {offsets = [0, 0], sizes = [8, 32], strides = [1, 1]} : vector<8x128xf32> to vector<8x32xf32>
    %19 = vector.extract_strided_slice %17 {offsets = [0, 32], sizes = [8, 32], strides = [1, 1]} : vector<8x128xf32> to vector<8x32xf32>
    %20 = vector.extract_strided_slice %17 {offsets = [0, 64], sizes = [8, 32], strides = [1, 1]} : vector<8x128xf32> to vector<8x32xf32>
    %21 = vector.extract_strided_slice %17 {offsets = [0, 96], sizes = [8, 32], strides = [1, 1]} : vector<8x128xf32> to vector<8x32xf32>
    %cst_12 = arith.constant 2.000000e+00 : f32
    %22 = vector.broadcast %cst_12 : f32 to vector<8x32xf32>
    %23 = arith.mulf %22, %21 : vector<8x32xf32>
    %cst_13 = arith.constant 1.000000e+00 : f32
    %24 = vector.broadcast %cst_13 : f32 to vector<8x32xf32>
    %25 = arith.subf %23, %24 : vector<8x32xf32>
    %26 = arith.mulf %19, %9 : vector<8x32xf32>
    %27 = arith.mulf %18, %25 : vector<8x32xf32>
    %28 = arith.addf %26, %27 : vector<8x32xf32>
    %29 = math.tanh %28 : vector<8x32xf32>
    %30 = arith.mulf %20, %29 : vector<8x32xf32>
    %31 = vector.extract_strided_slice %6 {offsets = [8, 0], sizes = [8, 128], strides = [1, 1]} : vector<96x128xf32> to vector<8x128xf32>
    %cst_14 = arith.constant dense<0.000000e+00> : vector<8x128xf32>
    %32 = tpu.matmul %30, %7, %cst_14 {dimension_numbers = #tpu.dot_dimension_numbers<[1], [0], [0], [1], [0, 0, 1, 1], [], []>} : vector<8x32xf32>, vector<32x128xf32>, vector<8x128xf32> -> vector<8x128xf32>
    %33 = arith.addf %31, %32 : vector<8x128xf32>
    %34 = arith.negf %33 : vector<8x128xf32>
    %35 = math.exp %34 : vector<8x128xf32>
    %cst_15 = arith.constant 1.000000e+00 : f32
    %36 = vector.broadcast %cst_15 : f32 to vector<8x128xf32>
    %37 = arith.addf %36, %35 : vector<8x128xf32>
    %38 = arith.divf %36, %37 : vector<8x128xf32>
    %39 = vector.extract_strided_slice %38 {offsets = [0, 0], sizes = [8, 32], strides = [1, 1]} : vector<8x128xf32> to vector<8x32xf32>
    %40 = vector.extract_strided_slice %38 {offsets = [0, 32], sizes = [8, 32], strides = [1, 1]} : vector<8x128xf32> to vector<8x32xf32>
    %41 = vector.extract_strided_slice %38 {offsets = [0, 64], sizes = [8, 32], strides = [1, 1]} : vector<8x128xf32> to vector<8x32xf32>
    %42 = vector.extract_strided_slice %38 {offsets = [0, 96], sizes = [8, 32], strides = [1, 1]} : vector<8x128xf32> to vector<8x32xf32>
    %cst_16 = arith.constant 2.000000e+00 : f32
    %43 = vector.broadcast %cst_16 : f32 to vector<8x32xf32>
    %44 = arith.mulf %43, %42 : vector<8x32xf32>
    %cst_17 = arith.constant 1.000000e+00 : f32
    %45 = vector.broadcast %cst_17 : f32 to vector<8x32xf32>
    %46 = arith.subf %44, %45 : vector<8x32xf32>
    %47 = arith.mulf %40, %28 : vector<8x32xf32>
    %48 = arith.mulf %39, %46 : vector<8x32xf32>
    %49 = arith.addf %47, %48 : vector<8x32xf32>
    %50 = math.tanh %49 : vector<8x32xf32>
    %51 = arith.mulf %41, %50 : vector<8x32xf32>
    %52 = vector.extract_strided_slice %6 {offsets = [16, 0], sizes = [8, 128], strides = [1, 1]} : vector<96x128xf32> to vector<8x128xf32>
    %cst_18 = arith.constant dense<0.000000e+00> : vector<8x128xf32>
    %53 = tpu.matmul %51, %7, %cst_18 {dimension_numbers = #tpu.dot_dimension_numbers<[1], [0], [0], [1], [0, 0, 1, 1], [], []>} : vector<8x32xf32>, vector<32x128xf32>, vector<8x128xf32> -> vector<8x128xf32>
    %54 = arith.addf %52, %53 : vector<8x128xf32>
    %55 = arith.negf %54 : vector<8x128xf32>
    %56 = math.exp %55 : vector<8x128xf32>
    %cst_19 = arith.constant 1.000000e+00 : f32
    %57 = vector.broadcast %cst_19 : f32 to vector<8x128xf32>
    %58 = arith.addf %57, %56 : vector<8x128xf32>
    %59 = arith.divf %57, %58 : vector<8x128xf32>
    %60 = vector.extract_strided_slice %59 {offsets = [0, 0], sizes = [8, 32], strides = [1, 1]} : vector<8x128xf32> to vector<8x32xf32>
    %61 = vector.extract_strided_slice %59 {offsets = [0, 32], sizes = [8, 32], strides = [1, 1]} : vector<8x128xf32> to vector<8x32xf32>
    %62 = vector.extract_strided_slice %59 {offsets = [0, 64], sizes = [8, 32], strides = [1, 1]} : vector<8x128xf32> to vector<8x32xf32>
    %63 = vector.extract_strided_slice %59 {offsets = [0, 96], sizes = [8, 32], strides = [1, 1]} : vector<8x128xf32> to vector<8x32xf32>
    %cst_20 = arith.constant 2.000000e+00 : f32
    %64 = vector.broadcast %cst_20 : f32 to vector<8x32xf32>
    %65 = arith.mulf %64, %63 : vector<8x32xf32>
    %cst_21 = arith.constant 1.000000e+00 : f32
    %66 = vector.broadcast %cst_21 : f32 to vector<8x32xf32>
    %67 = arith.subf %65, %66 : vector<8x32xf32>
    %68 = arith.mulf %61, %49 : vector<8x32xf32>
    %69 = arith.mulf %60, %67 : vector<8x32xf32>
    %70 = arith.addf %68, %69 : vector<8x32xf32>
    %71 = math.tanh %70 : vector<8x32xf32>
    %72 = arith.mulf %62, %71 : vector<8x32xf32>
    %73 = vector.extract_strided_slice %6 {offsets = [24, 0], sizes = [8, 128], strides = [1, 1]} : vector<96x128xf32> to vector<8x128xf32>
    %cst_22 = arith.constant dense<0.000000e+00> : vector<8x128xf32>
    %74 = tpu.matmul %72, %7, %cst_22 {dimension_numbers = #tpu.dot_dimension_numbers<[1], [0], [0], [1], [0, 0, 1, 1], [], []>} : vector<8x32xf32>, vector<32x128xf32>, vector<8x128xf32> -> vector<8x128xf32>
    %75 = arith.addf %73, %74 : vector<8x128xf32>
    %76 = arith.negf %75 : vector<8x128xf32>
    %77 = math.exp %76 : vector<8x128xf32>
    %cst_23 = arith.constant 1.000000e+00 : f32
    %78 = vector.broadcast %cst_23 : f32 to vector<8x128xf32>
    %79 = arith.addf %78, %77 : vector<8x128xf32>
    %80 = arith.divf %78, %79 : vector<8x128xf32>
    %81 = vector.extract_strided_slice %80 {offsets = [0, 0], sizes = [8, 32], strides = [1, 1]} : vector<8x128xf32> to vector<8x32xf32>
    %82 = vector.extract_strided_slice %80 {offsets = [0, 32], sizes = [8, 32], strides = [1, 1]} : vector<8x128xf32> to vector<8x32xf32>
    %83 = vector.extract_strided_slice %80 {offsets = [0, 64], sizes = [8, 32], strides = [1, 1]} : vector<8x128xf32> to vector<8x32xf32>
    %84 = vector.extract_strided_slice %80 {offsets = [0, 96], sizes = [8, 32], strides = [1, 1]} : vector<8x128xf32> to vector<8x32xf32>
    %cst_24 = arith.constant 2.000000e+00 : f32
    %85 = vector.broadcast %cst_24 : f32 to vector<8x32xf32>
    %86 = arith.mulf %85, %84 : vector<8x32xf32>
    %cst_25 = arith.constant 1.000000e+00 : f32
    %87 = vector.broadcast %cst_25 : f32 to vector<8x32xf32>
    %88 = arith.subf %86, %87 : vector<8x32xf32>
    %89 = arith.mulf %82, %70 : vector<8x32xf32>
    %90 = arith.mulf %81, %88 : vector<8x32xf32>
    %91 = arith.addf %89, %90 : vector<8x32xf32>
    %92 = math.tanh %91 : vector<8x32xf32>
    %93 = arith.mulf %83, %92 : vector<8x32xf32>
    %94 = vector.extract_strided_slice %6 {offsets = [32, 0], sizes = [8, 128], strides = [1, 1]} : vector<96x128xf32> to vector<8x128xf32>
    %cst_26 = arith.constant dense<0.000000e+00> : vector<8x128xf32>
    %95 = tpu.matmul %93, %7, %cst_26 {dimension_numbers = #tpu.dot_dimension_numbers<[1], [0], [0], [1], [0, 0, 1, 1], [], []>} : vector<8x32xf32>, vector<32x128xf32>, vector<8x128xf32> -> vector<8x128xf32>
    %96 = arith.addf %94, %95 : vector<8x128xf32>
    %97 = arith.negf %96 : vector<8x128xf32>
    %98 = math.exp %97 : vector<8x128xf32>
    %cst_27 = arith.constant 1.000000e+00 : f32
    %99 = vector.broadcast %cst_27 : f32 to vector<8x128xf32>
    %100 = arith.addf %99, %98 : vector<8x128xf32>
    %101 = arith.divf %99, %100 : vector<8x128xf32>
    %102 = vector.extract_strided_slice %101 {offsets = [0, 0], sizes = [8, 32], strides = [1, 1]} : vector<8x128xf32> to vector<8x32xf32>
    %103 = vector.extract_strided_slice %101 {offsets = [0, 32], sizes = [8, 32], strides = [1, 1]} : vector<8x128xf32> to vector<8x32xf32>
    %104 = vector.extract_strided_slice %101 {offsets = [0, 64], sizes = [8, 32], strides = [1, 1]} : vector<8x128xf32> to vector<8x32xf32>
    %105 = vector.extract_strided_slice %101 {offsets = [0, 96], sizes = [8, 32], strides = [1, 1]} : vector<8x128xf32> to vector<8x32xf32>
    %cst_28 = arith.constant 2.000000e+00 : f32
    %106 = vector.broadcast %cst_28 : f32 to vector<8x32xf32>
    %107 = arith.mulf %106, %105 : vector<8x32xf32>
    %cst_29 = arith.constant 1.000000e+00 : f32
    %108 = vector.broadcast %cst_29 : f32 to vector<8x32xf32>
    %109 = arith.subf %107, %108 : vector<8x32xf32>
    %110 = arith.mulf %103, %91 : vector<8x32xf32>
    %111 = arith.mulf %102, %109 : vector<8x32xf32>
    %112 = arith.addf %110, %111 : vector<8x32xf32>
    %113 = math.tanh %112 : vector<8x32xf32>
    %114 = arith.mulf %104, %113 : vector<8x32xf32>
    %115 = vector.extract_strided_slice %6 {offsets = [40, 0], sizes = [8, 128], strides = [1, 1]} : vector<96x128xf32> to vector<8x128xf32>
    %cst_30 = arith.constant dense<0.000000e+00> : vector<8x128xf32>
    %116 = tpu.matmul %114, %7, %cst_30 {dimension_numbers = #tpu.dot_dimension_numbers<[1], [0], [0], [1], [0, 0, 1, 1], [], []>} : vector<8x32xf32>, vector<32x128xf32>, vector<8x128xf32> -> vector<8x128xf32>
    %117 = arith.addf %115, %116 : vector<8x128xf32>
    %118 = arith.negf %117 : vector<8x128xf32>
    %119 = math.exp %118 : vector<8x128xf32>
    %cst_31 = arith.constant 1.000000e+00 : f32
    %120 = vector.broadcast %cst_31 : f32 to vector<8x128xf32>
    %121 = arith.addf %120, %119 : vector<8x128xf32>
    %122 = arith.divf %120, %121 : vector<8x128xf32>
    %123 = vector.extract_strided_slice %122 {offsets = [0, 0], sizes = [8, 32], strides = [1, 1]} : vector<8x128xf32> to vector<8x32xf32>
    %124 = vector.extract_strided_slice %122 {offsets = [0, 32], sizes = [8, 32], strides = [1, 1]} : vector<8x128xf32> to vector<8x32xf32>
    %125 = vector.extract_strided_slice %122 {offsets = [0, 64], sizes = [8, 32], strides = [1, 1]} : vector<8x128xf32> to vector<8x32xf32>
    %126 = vector.extract_strided_slice %122 {offsets = [0, 96], sizes = [8, 32], strides = [1, 1]} : vector<8x128xf32> to vector<8x32xf32>
    %cst_32 = arith.constant 2.000000e+00 : f32
    %127 = vector.broadcast %cst_32 : f32 to vector<8x32xf32>
    %128 = arith.mulf %127, %126 : vector<8x32xf32>
    %cst_33 = arith.constant 1.000000e+00 : f32
    %129 = vector.broadcast %cst_33 : f32 to vector<8x32xf32>
    %130 = arith.subf %128, %129 : vector<8x32xf32>
    %131 = arith.mulf %124, %112 : vector<8x32xf32>
    %132 = arith.mulf %123, %130 : vector<8x32xf32>
    %133 = arith.addf %131, %132 : vector<8x32xf32>
    %134 = math.tanh %133 : vector<8x32xf32>
    %135 = arith.mulf %125, %134 : vector<8x32xf32>
    %136 = vector.extract_strided_slice %6 {offsets = [48, 0], sizes = [8, 128], strides = [1, 1]} : vector<96x128xf32> to vector<8x128xf32>
    %cst_34 = arith.constant dense<0.000000e+00> : vector<8x128xf32>
    %137 = tpu.matmul %135, %7, %cst_34 {dimension_numbers = #tpu.dot_dimension_numbers<[1], [0], [0], [1], [0, 0, 1, 1], [], []>} : vector<8x32xf32>, vector<32x128xf32>, vector<8x128xf32> -> vector<8x128xf32>
    %138 = arith.addf %136, %137 : vector<8x128xf32>
    %139 = arith.negf %138 : vector<8x128xf32>
    %140 = math.exp %139 : vector<8x128xf32>
    %cst_35 = arith.constant 1.000000e+00 : f32
    %141 = vector.broadcast %cst_35 : f32 to vector<8x128xf32>
    %142 = arith.addf %141, %140 : vector<8x128xf32>
    %143 = arith.divf %141, %142 : vector<8x128xf32>
    %144 = vector.extract_strided_slice %143 {offsets = [0, 0], sizes = [8, 32], strides = [1, 1]} : vector<8x128xf32> to vector<8x32xf32>
    %145 = vector.extract_strided_slice %143 {offsets = [0, 32], sizes = [8, 32], strides = [1, 1]} : vector<8x128xf32> to vector<8x32xf32>
    %146 = vector.extract_strided_slice %143 {offsets = [0, 64], sizes = [8, 32], strides = [1, 1]} : vector<8x128xf32> to vector<8x32xf32>
    %147 = vector.extract_strided_slice %143 {offsets = [0, 96], sizes = [8, 32], strides = [1, 1]} : vector<8x128xf32> to vector<8x32xf32>
    %cst_36 = arith.constant 2.000000e+00 : f32
    %148 = vector.broadcast %cst_36 : f32 to vector<8x32xf32>
    %149 = arith.mulf %148, %147 : vector<8x32xf32>
    %cst_37 = arith.constant 1.000000e+00 : f32
    %150 = vector.broadcast %cst_37 : f32 to vector<8x32xf32>
    %151 = arith.subf %149, %150 : vector<8x32xf32>
    %152 = arith.mulf %145, %133 : vector<8x32xf32>
    %153 = arith.mulf %144, %151 : vector<8x32xf32>
    %154 = arith.addf %152, %153 : vector<8x32xf32>
    %155 = math.tanh %154 : vector<8x32xf32>
    %156 = arith.mulf %146, %155 : vector<8x32xf32>
    %157 = vector.extract_strided_slice %6 {offsets = [56, 0], sizes = [8, 128], strides = [1, 1]} : vector<96x128xf32> to vector<8x128xf32>
    %cst_38 = arith.constant dense<0.000000e+00> : vector<8x128xf32>
    %158 = tpu.matmul %156, %7, %cst_38 {dimension_numbers = #tpu.dot_dimension_numbers<[1], [0], [0], [1], [0, 0, 1, 1], [], []>} : vector<8x32xf32>, vector<32x128xf32>, vector<8x128xf32> -> vector<8x128xf32>
    %159 = arith.addf %157, %158 : vector<8x128xf32>
    %160 = arith.negf %159 : vector<8x128xf32>
    %161 = math.exp %160 : vector<8x128xf32>
    %cst_39 = arith.constant 1.000000e+00 : f32
    %162 = vector.broadcast %cst_39 : f32 to vector<8x128xf32>
    %163 = arith.addf %162, %161 : vector<8x128xf32>
    %164 = arith.divf %162, %163 : vector<8x128xf32>
    %165 = vector.extract_strided_slice %164 {offsets = [0, 0], sizes = [8, 32], strides = [1, 1]} : vector<8x128xf32> to vector<8x32xf32>
    %166 = vector.extract_strided_slice %164 {offsets = [0, 32], sizes = [8, 32], strides = [1, 1]} : vector<8x128xf32> to vector<8x32xf32>
    %167 = vector.extract_strided_slice %164 {offsets = [0, 64], sizes = [8, 32], strides = [1, 1]} : vector<8x128xf32> to vector<8x32xf32>
    %168 = vector.extract_strided_slice %164 {offsets = [0, 96], sizes = [8, 32], strides = [1, 1]} : vector<8x128xf32> to vector<8x32xf32>
    %cst_40 = arith.constant 2.000000e+00 : f32
    %169 = vector.broadcast %cst_40 : f32 to vector<8x32xf32>
    %170 = arith.mulf %169, %168 : vector<8x32xf32>
    %cst_41 = arith.constant 1.000000e+00 : f32
    %171 = vector.broadcast %cst_41 : f32 to vector<8x32xf32>
    %172 = arith.subf %170, %171 : vector<8x32xf32>
    %173 = arith.mulf %166, %154 : vector<8x32xf32>
    %174 = arith.mulf %165, %172 : vector<8x32xf32>
    %175 = arith.addf %173, %174 : vector<8x32xf32>
    %176 = math.tanh %175 : vector<8x32xf32>
    %177 = arith.mulf %167, %176 : vector<8x32xf32>
    %178 = vector.extract_strided_slice %6 {offsets = [64, 0], sizes = [8, 128], strides = [1, 1]} : vector<96x128xf32> to vector<8x128xf32>
    %cst_42 = arith.constant dense<0.000000e+00> : vector<8x128xf32>
    %179 = tpu.matmul %177, %7, %cst_42 {dimension_numbers = #tpu.dot_dimension_numbers<[1], [0], [0], [1], [0, 0, 1, 1], [], []>} : vector<8x32xf32>, vector<32x128xf32>, vector<8x128xf32> -> vector<8x128xf32>
    %180 = arith.addf %178, %179 : vector<8x128xf32>
    %181 = arith.negf %180 : vector<8x128xf32>
    %182 = math.exp %181 : vector<8x128xf32>
    %cst_43 = arith.constant 1.000000e+00 : f32
    %183 = vector.broadcast %cst_43 : f32 to vector<8x128xf32>
    %184 = arith.addf %183, %182 : vector<8x128xf32>
    %185 = arith.divf %183, %184 : vector<8x128xf32>
    %186 = vector.extract_strided_slice %185 {offsets = [0, 0], sizes = [8, 32], strides = [1, 1]} : vector<8x128xf32> to vector<8x32xf32>
    %187 = vector.extract_strided_slice %185 {offsets = [0, 32], sizes = [8, 32], strides = [1, 1]} : vector<8x128xf32> to vector<8x32xf32>
    %188 = vector.extract_strided_slice %185 {offsets = [0, 64], sizes = [8, 32], strides = [1, 1]} : vector<8x128xf32> to vector<8x32xf32>
    %189 = vector.extract_strided_slice %185 {offsets = [0, 96], sizes = [8, 32], strides = [1, 1]} : vector<8x128xf32> to vector<8x32xf32>
    %cst_44 = arith.constant 2.000000e+00 : f32
    %190 = vector.broadcast %cst_44 : f32 to vector<8x32xf32>
    %191 = arith.mulf %190, %189 : vector<8x32xf32>
    %cst_45 = arith.constant 1.000000e+00 : f32
    %192 = vector.broadcast %cst_45 : f32 to vector<8x32xf32>
    %193 = arith.subf %191, %192 : vector<8x32xf32>
    %194 = arith.mulf %187, %175 : vector<8x32xf32>
    %195 = arith.mulf %186, %193 : vector<8x32xf32>
    %196 = arith.addf %194, %195 : vector<8x32xf32>
    %197 = math.tanh %196 : vector<8x32xf32>
    %198 = arith.mulf %188, %197 : vector<8x32xf32>
    %199 = vector.extract_strided_slice %6 {offsets = [72, 0], sizes = [8, 128], strides = [1, 1]} : vector<96x128xf32> to vector<8x128xf32>
    %cst_46 = arith.constant dense<0.000000e+00> : vector<8x128xf32>
    %200 = tpu.matmul %198, %7, %cst_46 {dimension_numbers = #tpu.dot_dimension_numbers<[1], [0], [0], [1], [0, 0, 1, 1], [], []>} : vector<8x32xf32>, vector<32x128xf32>, vector<8x128xf32> -> vector<8x128xf32>
    %201 = arith.addf %199, %200 : vector<8x128xf32>
    %202 = arith.negf %201 : vector<8x128xf32>
    %203 = math.exp %202 : vector<8x128xf32>
    %cst_47 = arith.constant 1.000000e+00 : f32
    %204 = vector.broadcast %cst_47 : f32 to vector<8x128xf32>
    %205 = arith.addf %204, %203 : vector<8x128xf32>
    %206 = arith.divf %204, %205 : vector<8x128xf32>
    %207 = vector.extract_strided_slice %206 {offsets = [0, 0], sizes = [8, 32], strides = [1, 1]} : vector<8x128xf32> to vector<8x32xf32>
    %208 = vector.extract_strided_slice %206 {offsets = [0, 32], sizes = [8, 32], strides = [1, 1]} : vector<8x128xf32> to vector<8x32xf32>
    %209 = vector.extract_strided_slice %206 {offsets = [0, 64], sizes = [8, 32], strides = [1, 1]} : vector<8x128xf32> to vector<8x32xf32>
    %210 = vector.extract_strided_slice %206 {offsets = [0, 96], sizes = [8, 32], strides = [1, 1]} : vector<8x128xf32> to vector<8x32xf32>
    %cst_48 = arith.constant 2.000000e+00 : f32
    %211 = vector.broadcast %cst_48 : f32 to vector<8x32xf32>
    %212 = arith.mulf %211, %210 : vector<8x32xf32>
    %cst_49 = arith.constant 1.000000e+00 : f32
    %213 = vector.broadcast %cst_49 : f32 to vector<8x32xf32>
    %214 = arith.subf %212, %213 : vector<8x32xf32>
    %215 = arith.mulf %208, %196 : vector<8x32xf32>
    %216 = arith.mulf %207, %214 : vector<8x32xf32>
    %217 = arith.addf %215, %216 : vector<8x32xf32>
    %218 = math.tanh %217 : vector<8x32xf32>
    %219 = arith.mulf %209, %218 : vector<8x32xf32>
    %220 = vector.extract_strided_slice %6 {offsets = [80, 0], sizes = [8, 128], strides = [1, 1]} : vector<96x128xf32> to vector<8x128xf32>
    %cst_50 = arith.constant dense<0.000000e+00> : vector<8x128xf32>
    %221 = tpu.matmul %219, %7, %cst_50 {dimension_numbers = #tpu.dot_dimension_numbers<[1], [0], [0], [1], [0, 0, 1, 1], [], []>} : vector<8x32xf32>, vector<32x128xf32>, vector<8x128xf32> -> vector<8x128xf32>
    %222 = arith.addf %220, %221 : vector<8x128xf32>
    %223 = arith.negf %222 : vector<8x128xf32>
    %224 = math.exp %223 : vector<8x128xf32>
    %cst_51 = arith.constant 1.000000e+00 : f32
    %225 = vector.broadcast %cst_51 : f32 to vector<8x128xf32>
    %226 = arith.addf %225, %224 : vector<8x128xf32>
    %227 = arith.divf %225, %226 : vector<8x128xf32>
    %228 = vector.extract_strided_slice %227 {offsets = [0, 0], sizes = [8, 32], strides = [1, 1]} : vector<8x128xf32> to vector<8x32xf32>
    %229 = vector.extract_strided_slice %227 {offsets = [0, 32], sizes = [8, 32], strides = [1, 1]} : vector<8x128xf32> to vector<8x32xf32>
    %230 = vector.extract_strided_slice %227 {offsets = [0, 64], sizes = [8, 32], strides = [1, 1]} : vector<8x128xf32> to vector<8x32xf32>
    %231 = vector.extract_strided_slice %227 {offsets = [0, 96], sizes = [8, 32], strides = [1, 1]} : vector<8x128xf32> to vector<8x32xf32>
    %cst_52 = arith.constant 2.000000e+00 : f32
    %232 = vector.broadcast %cst_52 : f32 to vector<8x32xf32>
    %233 = arith.mulf %232, %231 : vector<8x32xf32>
    %cst_53 = arith.constant 1.000000e+00 : f32
    %234 = vector.broadcast %cst_53 : f32 to vector<8x32xf32>
    %235 = arith.subf %233, %234 : vector<8x32xf32>
    %236 = arith.mulf %229, %217 : vector<8x32xf32>
    %237 = arith.mulf %228, %235 : vector<8x32xf32>
    %238 = arith.addf %236, %237 : vector<8x32xf32>
    %239 = math.tanh %238 : vector<8x32xf32>
    %240 = arith.mulf %230, %239 : vector<8x32xf32>
    %241 = vector.extract_strided_slice %6 {offsets = [88, 0], sizes = [8, 128], strides = [1, 1]} : vector<96x128xf32> to vector<8x128xf32>
    %cst_54 = arith.constant dense<0.000000e+00> : vector<8x128xf32>
    %242 = tpu.matmul %240, %7, %cst_54 {dimension_numbers = #tpu.dot_dimension_numbers<[1], [0], [0], [1], [0, 0, 1, 1], [], []>} : vector<8x32xf32>, vector<32x128xf32>, vector<8x128xf32> -> vector<8x128xf32>
    %243 = arith.addf %241, %242 : vector<8x128xf32>
    %244 = arith.negf %243 : vector<8x128xf32>
    %245 = math.exp %244 : vector<8x128xf32>
    %cst_55 = arith.constant 1.000000e+00 : f32
    %246 = vector.broadcast %cst_55 : f32 to vector<8x128xf32>
    %247 = arith.addf %246, %245 : vector<8x128xf32>
    %248 = arith.divf %246, %247 : vector<8x128xf32>
    %249 = vector.extract_strided_slice %248 {offsets = [0, 0], sizes = [8, 32], strides = [1, 1]} : vector<8x128xf32> to vector<8x32xf32>
    %250 = vector.extract_strided_slice %248 {offsets = [0, 32], sizes = [8, 32], strides = [1, 1]} : vector<8x128xf32> to vector<8x32xf32>
    %251 = vector.extract_strided_slice %248 {offsets = [0, 64], sizes = [8, 32], strides = [1, 1]} : vector<8x128xf32> to vector<8x32xf32>
    %252 = vector.extract_strided_slice %248 {offsets = [0, 96], sizes = [8, 32], strides = [1, 1]} : vector<8x128xf32> to vector<8x32xf32>
    %cst_56 = arith.constant 2.000000e+00 : f32
    %253 = vector.broadcast %cst_56 : f32 to vector<8x32xf32>
    %254 = arith.mulf %253, %252 : vector<8x32xf32>
    %cst_57 = arith.constant 1.000000e+00 : f32
    %255 = vector.broadcast %cst_57 : f32 to vector<8x32xf32>
    %256 = arith.subf %254, %255 : vector<8x32xf32>
    %257 = arith.mulf %250, %238 : vector<8x32xf32>
    %258 = arith.mulf %249, %256 : vector<8x32xf32>
    %259 = arith.addf %257, %258 : vector<8x32xf32>
    %260 = math.tanh %259 : vector<8x32xf32>
    %261 = arith.mulf %251, %260 : vector<8x32xf32>
    %c0_58 = arith.constant 0 : index
    %c0_59 = arith.constant 0 : index
    %262 = vector.load %arg4[%c0_58, %c0_59] : memref<1x32xf32, #tpu.memory_space<vmem>>, vector<1x32xf32>
    %263 = vector.broadcast %262 : vector<1x32xf32> to vector<8x32xf32>
    %264 = arith.mulf %261, %263 : vector<8x32xf32>
    %cst_60 = arith.constant dense<0.000000e+00> : vector<8xf32>
    %265 = vector.multi_reduction <add>, %264, %cst_60 [1] : vector<8x32xf32> to vector<8xf32>
    %266 = vector.shape_cast %265 : vector<8xf32> to vector<8x1xf32>
    %c0_61 = arith.constant 0 : index
    %c0_62 = arith.constant 0 : index
    %267 = vector.load %arg5[%c0_61, %c0_62] : memref<1x1xf32, #tpu.memory_space<vmem>>, vector<1x1xf32>
    %268 = vector.broadcast %267 : vector<1x1xf32> to vector<8x1xf32>
    %269 = arith.addf %266, %268 : vector<8x1xf32>
    %c0_63 = arith.constant 0 : index
    %c0_64 = arith.constant 0 : index
    %270 = vector.load %arg6[%c0_63, %c0_64] : memref<8x1xf32, #tpu.memory_space<vmem>>, vector<8x1xf32>
    tpu.vector_store %arg6[%c0_63, %c0_64], %269 {strides = array<i32>} : memref<8x1xf32, #tpu.memory_space<vmem>>, vector<8x1xf32>,
    return
  }
}

</mosaic_0001>

<bundles_post_ra>
// kernel: lstm_model_forward.1
= control target key start
LH: loop header
LB: loop body
LE: loop exit
PB: predicated region body
PF: predicated region fallthrough
CT: control target
= control target key end

     0   :  { %vm43_vm0 = vcmask 130048   ;;  %v1060_v9 = vmov 0.0   ;;  %s1062_s19 = smov 64   ;;  %vm137_vm5 = vcmask 261120   ;;  %s1325_s1 = inlined_call_operand.vmem [shape: f32[16,128], index: 1, kind: input, shape index: {}]   ;;  %s1326_s0 = inlined_call_operand.vmem [shape: f32[12,8,16], index: 0, kind: input, shape index: {}]   ;;  %s1327_s2 = inlined_call_operand.vmem [shape: f32[32,128], index: 2, kind: input, shape index: {}]   ;;  %s1328_s3 = inlined_call_operand.vmem [shape: f32[1,128], index: 3, kind: input, shape index: {}]   ;;  %s1329_s4 = inlined_call_operand.vmem [shape: f32[1,32], index: 4, kind: input, shape index: {}]   ;;  %s1330_s5 = inlined_call_operand.<no memory space> [shape: f32[1,1], index: 5, kind: input, shape index: {}]   ;;  %s1331_s6 = inlined_call_operand.vmem [shape: f32[8,1], index: 6, kind: output, shape index: {}]  }
   0x1   :  { %v38_v0 = vld [vmem:[%s1325_s1 + $0x8] sm:$0xff]  ;;  %v37_v1 = vld [vmem:[%s1325_s1] sm:$0xff]  ;;  %v31_v2 = vld [vmem:[%s1326_s0 + $0x30] sm:$0xff] }
   0x2   :  { %976 = vmatpush.msra.mxu1 %v38_v0  ;;  %94 = vmatpush.msra.mxu0 %v38_v0  ;;  %v1110_v3 = vld [vmem:[%s1327_s2 + $0x18] sm:$0xff]  ;;  %v25_v4 = vld [vmem:[%s1326_s0] sm:$0xff]  ;;  %v1119_v5 = vld [vmem:[%s1327_s2 + $0x10] sm:$0xff] }
   0x3   :  { %977 = vmatpush.msra.mxu2 %v38_v0  ;;  %978 = vmatpush.msra.mxu3 %v38_v0  ;;  %v1126_v6 = vld [vmem:[%s1327_s2 + $0x8] sm:$0xff]  ;;  %v1134_v7 = vld [vmem:[%s1327_s2] sm:$0xff]  ;;  %v32_v8 = vld [vmem:[%s1326_s0 + $0x38] sm:$0xff] }
   0x4   :  { %979 = vmatpush.msra.mxu1 %v37_v1  ;;  %95 = vmatpush.msra.mxu0 %v37_v1  ;;  %v1163_v13 = vld [vmem:[%s1328_s3] ss:$0 sm:$0xff]  ;;  %s1061_s3 = smov 32   ;;  %v34_v39 = vld [vmem:[%s1326_s0 + $0x48] sm:$0xff] }
   0x5   :  { %935 = vmatmul.msk.f32.vlgmr.msra.gmra.mxu1 %vm43_vm0, %v31_v2  ;;  %929 = vmatmul.msk.f32.vlgmr.msra.gmra.mxu0 %vm43_vm0, %v25_v4  ;;  %v33_v38 = vld [vmem:[%s1326_s0 + $0x40] sm:$0xff]  ;;  %v26_v42 = vld [vmem:[%s1326_s0 + $0x8] sm:$0xff] }
   0x6   :  { %153 = vmatpush.msrb.mxu1 %v1110_v3  ;;  %980 = vmatpush.msra.mxu2 %v37_v1 }
   0x7   :  { %981 = vmatpush.msra.mxu3 %v37_v1  ;;  %937 = vmatmul.msk.f32.vlgmr.msra.gmra.mxu2 %vm43_vm0, %v33_v38 }
   0x8   :  { %217 = vmatpush.msrb.mxu2 %v1110_v3  ;;  %154 = vmatpush.msrb.mxu1 %v1119_v5 }
   0x9   :  { %281 = vmatpush.msrb.mxu3 %v1110_v3 }
   0xa   :  { %218 = vmatpush.msrb.mxu2 %v1119_v5  ;;  %155 = vmatpush.msrb.mxu1 %v1126_v6 }
   0xb   :  { %282 = vmatpush.msrb.mxu3 %v1119_v5 }
   0xc   :  { %219 = vmatpush.msrb.mxu2 %v1126_v6  ;;  %156 = vmatpush.msrb.mxu1 %v1134_v7 }
   0xd   :  { %283 = vmatpush.msrb.mxu3 %v1126_v6  ;;  %936 = vmatmul.msk.f32.gmra.mxu1 %vm43_vm0, %v32_v8 }
   0xe   :  { %220 = vmatpush.msrb.mxu2 %v1134_v7  ;;  %345 = vmatpush.msra.mxu1 %v1110_v3 }
   0xf   :  { %284 = vmatpush.msrb.mxu3 %v1134_v7  ;;  %938 = vmatmul.msk.f32.gmra.mxu2 %vm43_vm0, %v34_v39 }
  0x10   :  { %346 = vmatpush.msra.mxu1 %v1119_v5  ;;  %409 = vmatpush.msra.mxu2 %v1110_v3 }
  0x11   :  { %930 = vmatmul.msk.f32.gmra.mxu0 %vm43_vm0, %v26_v42 }
  0x12   :  { %347 = vmatpush.msra.mxu1 %v1126_v6  ;;  %410 = vmatpush.msra.mxu2 %v1119_v5 }
  0x14   :  { %348 = vmatpush.msra.mxu1 %v1134_v7  ;;  %411 = vmatpush.msra.mxu2 %v1126_v6 }
  0x15   :  { %157 = vmatmul.f32.vlgmr.msrb.gmra.mxu1 %v1060_v9 }
  0x16   :  { %537 = vmatpush.msrb.mxu1 %v1110_v3  ;;  %412 = vmatpush.msra.mxu2 %v1134_v7 }
  0x18   :  { %538 = vmatpush.msrb.mxu1 %v1119_v5 }
  0x1a   :  { %539 = vmatpush.msrb.mxu1 %v1126_v6 }
  0x1c   :  { %540 = vmatpush.msrb.mxu1 %v1134_v7 }
  0x82   :  { %v1156_v10 = vpop.f32.mrf.mxu1  ;;  %v97_v12 = vpop.f32.mrf.mxu0 }
  0x83   :  { %v98_v14 = vadd.f32 %v1163_v13, %v97_v12 }
  0x8a   :  { %v1158_v11 = vpop.f32.mrf.mxu1  ;;  %v1191_v44 = vpop.f32.mrf.mxu2 }
  0x8e   :  { %v100_v46 = vpop.f32.mrf.mxu0 }
  0x8f   :  { %v101_v47 = vadd.f32 %v1163_v13, %v100_v46 }
  0x92   :  { %v158_v15 = vpop.f32.mrf.mxu1  ;;  %v1193_v45 = vpop.f32.mrf.mxu2 }
  0x93   :  { %v161_v16 = vadd.f32 %v158_v15, %v98_v14  ;;  %v35_v14 = vld [vmem:[%s1326_s0 + $0x50] sm:$0xff]  ;;  %v36_v15 = vld [vmem:[%s1326_s0 + $0x58] sm:$0xff] }
  0x94   :  { %939 = vmatmul.msk.f32.vlgmr.msra.gmra.mxu3 %vm43_vm0, %v35_v14 }
  0x95   :  { %v941_v17 = vmul.f32 -1.442695, %v161_v16  ;;  %473 = vmatpush.msra.mxu3 %v1110_v3 }
  0x97   :  { %988 = vpow2.f32 %v941_v17  ;;  %474 = vmatpush.msra.mxu3 %v1119_v5 }
  0x99   :  { %475 = vmatpush.msra.mxu3 %v1126_v6 }
  0x9b   :  { %476 = vmatpush.msra.mxu3 %v1134_v7 }
  0x9c   :  { %940 = vmatmul.msk.f32.gmra.mxu3 %vm43_vm0, %v36_v15 }
  0x9d   :  { %v989_v18 = vpop.eup %988 }
  0x9e   :  { %v165_v19 = vadd.f32 1.0, %v989_v18  ;;  %v27_v18 = vld [vmem:[%s1326_s0 + $0x10] sm:$0xff] }
  0x9f   :  { %931 = vmatmul.msk.f32.gmra.mxu0 %vm43_vm0, %v27_v18 }
  0xa0   :  { %990 = vrcp.f32 %v165_v19  ;;  %v177_v23 = vand.u32 2147483648, %v165_v19  ;;  %v175_v25 = vand.u32 2147483647, %v165_v19  ;;  %vm171_vm2 = vweird.f32 %v165_v19 }
  0xa2   :  { %v178_v27 = vor.u32 1.1754944e-38, %v177_v23  ;;  %vm176_vm4 = vcmp.eq.f32.partialorder %v175_v25, 8.507059e+37 }
  0xa6   :  { %v991_v20 = vpop.eup %990 }
  0xa7   :  { %v167_v21 = vmul.f32 %v991_v20, %v165_v19  ;;  %vm172_vm1 = vweird.f32 %v991_v20 }
  0xa8   :  { %vm173_vm3 = vmor %vm171_vm2, %vm172_vm1 }
  0xa9   :  { %v168_v22 = vsub.f32 1.0, %v167_v21 }
  0xab   :  { %v169_v24 = vmul.f32 %v991_v20, %v168_v22 }
  0xad   :  { %v170_v26 = vadd.f32 %v991_v20, %v169_v24 }
  0xaf   :  { %v174_v28 = vsel %vm173_vm3, %v991_v20, %v170_v26 }
  0xb0   :  { %v179_v29 = vsel %vm176_vm4, %v178_v27, %v174_v28 }
  0xb1   :  { %v181_v30 = vmul.f32 2.0, %v179_v29  ;;  %v183_v34 = vmul.f32 0.0, %v179_v29 }
  0xb3   :  { %v942_v31 = vadd.f32 -1.0, %v181_v30 }
  0xb5   :  { %185 = vrot.lane.b32.xlu0 %v942_v31, %s1061_s3 }
 0x117   :  { %v1221_v20 = vpop.f32.mrf.mxu3 }
 0x11c   :  { %v103_v22 = vpop.f32.mrf.mxu0 }
 0x11d   :  { %v104_v23 = vadd.f32 %v1163_v13, %v103_v22 }
 0x11f   :  { %v1223_v21 = vpop.f32.mrf.mxu3 }
 0x127   :  { %v186_v32 = vpop.permute.xlu0 %185 }
 0x128   :  { %v188_v33 = vmul.f32 %v186_v32, %v179_v29 }
 0x12a   :  { %190 = vrot.lane.b32.xlu0 %v188_v33, %s1061_s3 }
 0x19c   :  { %v191_v35 = vpop.permute.xlu0 %190 }
 0x19d   :  { %v193_v36 = vadd.f32 %v191_v35, %v183_v34 }
 0x19f   :  { %992 = vtanh.f32 %v193_v36 }
 0x1a5   :  { %v993_v37 = vpop.eup %992 }
 0x1a6   :  { %196 = vrot.lane.b32.xlu1 %v993_v37, %s1061_s3 }
 0x218   :  { %v197_v40 = vpop.permute.xlu1 %196 }
 0x219   :  { %v199_v41 = vmul.f32 %v197_v40, %v179_v29 }
 0x21b   :  { %201 = vrot.lane.b32.xlu1 %v199_v41, %s1062_s19 }
 0x28d   :  { %v202_v43 = vpop.permute.xlu1 %201 }
 0x28e   :  { %943 = vmatmul.msk.f32.vlgmr.msrb.gmra.mxu2 %vm137_vm5, %v202_v43 }
 0x28f   :  { %601 = vmatpush.msrb.mxu2 %v1110_v3 }
 0x291   :  { %602 = vmatpush.msrb.mxu2 %v1119_v5 }
 0x293   :  { %603 = vmatpush.msrb.mxu2 %v1126_v6 }
 0x295   :  { %604 = vmatpush.msrb.mxu2 %v1134_v7 }
 0x311   :  { %v222_v48 = vpop.f32.mrf.mxu2 }
 0x312   :  { %v225_v49 = vadd.f32 %v222_v48, %v101_v47 }
 0x314   :  { %v944_v50 = vmul.f32 -1.442695, %v225_v49  ;;  %v28_v49 = vld [vmem:[%s1326_s0 + $0x18] sm:$0xff] }
 0x315   :  { %932 = vmatmul.msk.f32.gmra.mxu0 %vm43_vm0, %v28_v49 }
 0x316   :  { %994 = vpow2.f32 %v944_v50 }
 0x31c   :  { %v995_v51 = vpop.eup %994 }
 0x31d   :  { %v229_v52 = vadd.f32 1.0, %v995_v51 }
 0x31f   :  { %996 = vrcp.f32 %v229_v52  ;;  %v241_v56 = vand.u32 2147483648, %v229_v52  ;;  %v239_v58 = vand.u32 2147483647, %v229_v52  ;;  %vm235_vm7 = vweird.f32 %v229_v52 }
 0x321   :  { %v242_v60 = vor.u32 1.1754944e-38, %v241_v56  ;;  %vm240_vm9 = vcmp.eq.f32.partialorder %v239_v58, 8.507059e+37 }
 0x325   :  { %v997_v53 = vpop.eup %996 }
 0x326   :  { %v231_v54 = vmul.f32 %v997_v53, %v229_v52  ;;  %vm236_vm6 = vweird.f32 %v997_v53 }
 0x327   :  { %vm237_vm8 = vmor %vm235_vm7, %vm236_vm6 }
 0x328   :  { %v232_v55 = vsub.f32 1.0, %v231_v54 }
 0x32a   :  { %v233_v57 = vmul.f32 %v997_v53, %v232_v55 }
 0x32c   :  { %v234_v59 = vadd.f32 %v997_v53, %v233_v57 }
 0x32e   :  { %v238_v61 = vsel %vm237_vm8, %v997_v53, %v234_v59 }
 0x32f   :  { %v243_v62 = vsel %vm240_vm9, %v242_v60, %v238_v61 }
 0x330   :  { %v245_v63 = vmul.f32 2.0, %v243_v62  ;;  %v247_v4 = vmul.f32 %v243_v62, %v193_v36 }
 0x332   :  { %v945_v0 = vadd.f32 -1.0, %v245_v63 }
 0x334   :  { %249 = vrot.lane.b32.xlu2 %v945_v0, %s1061_s3 }
 0x38e   :  { %v250_v1 = vpop.permute.xlu2 %249 }
 0x38f   :  { %v252_v2 = vmul.f32 %v250_v1, %v243_v62 }
 0x391   :  { %254 = vrot.lane.b32.xlu2 %v252_v2, %s1061_s3 }
 0x392   :  { %v106_v53 = vpop.f32.mrf.mxu0 }
 0x393   :  { %v107_v54 = vadd.f32 %v1163_v13, %v106_v53 }
 0x3eb   :  { %v255_v8 = vpop.permute.xlu2 %254 }
 0x3ec   :  { %v257_v9 = vadd.f32 %v255_v8, %v247_v4 }
 0x3ee   :  { %998 = vtanh.f32 %v257_v9 }
 0x3f4   :  { %v999_v12 = vpop.eup %998 }
 0x3f5   :  { %260 = vrot.lane.b32.xlu0 %v999_v12, %s1061_s3 }
 0x467   :  { %v261_v16 = vpop.permute.xlu0 %260 }
 0x468   :  { %v263_v17 = vmul.f32 %v261_v16, %v243_v62 }
 0x46a   :  { %265 = vrot.lane.b32.xlu1 %v263_v17, %s1062_s19 }
 0x4dc   :  { %v266_v19 = vpop.permute.xlu1 %265 }
 0x4dd   :  { %946 = vmatmul.msk.f32.vlgmr.msrb.gmra.mxu3 %vm137_vm5, %v266_v19 }
 0x4de   :  { %665 = vmatpush.msrb.mxu3 %v1110_v3 }
 0x4e0   :  { %666 = vmatpush.msrb.mxu3 %v1119_v5 }
 0x4e2   :  { %667 = vmatpush.msrb.mxu3 %v1126_v6 }
 0x4e4   :  { %668 = vmatpush.msrb.mxu3 %v1134_v7 }
 0x560   :  { %v286_v24 = vpop.f32.mrf.mxu3 }
 0x561   :  { %v289_v25 = vadd.f32 %v286_v24, %v104_v23 }
 0x563   :  { %v947_v26 = vmul.f32 -1.442695, %v289_v25  ;;  %v29_v25 = vld [vmem:[%s1326_s0 + $0x20] sm:$0xff] }
 0x564   :  { %933 = vmatmul.msk.f32.gmra.mxu0 %vm43_vm0, %v29_v25 }
 0x565   :  { %1000 = vpow2.f32 %v947_v26 }
 0x56b   :  { %v1001_v27 = vpop.eup %1000 }
 0x56c   :  { %v293_v28 = vadd.f32 1.0, %v1001_v27 }
 0x56e   :  { %1002 = vrcp.f32 %v293_v28  ;;  %v305_v32 = vand.u32 2147483648, %v293_v28  ;;  %v303_v34 = vand.u32 2147483647, %v293_v28  ;;  %vm299_vm11 = vweird.f32 %v293_v28 }
 0x570   :  { %v306_v36 = vor.u32 1.1754944e-38, %v305_v32  ;;  %vm304_vm13 = vcmp.eq.f32.partialorder %v303_v34, 8.507059e+37 }
 0x574   :  { %v1003_v29 = vpop.eup %1002 }
 0x575   :  { %v295_v30 = vmul.f32 %v1003_v29, %v293_v28  ;;  %vm300_vm10 = vweird.f32 %v1003_v29 }
 0x576   :  { %vm301_vm12 = vmor %vm299_vm11, %vm300_vm10 }
 0x577   :  { %v296_v31 = vsub.f32 1.0, %v295_v30 }
 0x579   :  { %v297_v33 = vmul.f32 %v1003_v29, %v296_v31 }
 0x57b   :  { %v298_v35 = vadd.f32 %v1003_v29, %v297_v33 }
 0x57d   :  { %v302_v37 = vsel %vm301_vm12, %v1003_v29, %v298_v35 }
 0x57e   :  { %v307_v38 = vsel %vm304_vm13, %v306_v36, %v302_v37 }
 0x57f   :  { %v309_v39 = vmul.f32 2.0, %v307_v38  ;;  %v311_v43 = vmul.f32 %v307_v38, %v257_v9 }
 0x581   :  { %v948_v40 = vadd.f32 -1.0, %v309_v39 }
 0x583   :  { %313 = vrot.lane.b32.xlu2 %v948_v40, %s1061_s3 }
 0x5dd   :  { %v314_v41 = vpop.permute.xlu2 %313 }
 0x5de   :  { %v316_v42 = vmul.f32 %v314_v41, %v307_v38 }
 0x5e0   :  { %318 = vrot.lane.b32.xlu0 %v316_v42, %s1061_s3 }
 0x5e1   :  { %v109_v27 = vpop.f32.mrf.mxu0 }
 0x5e2   :  { %v110_v28 = vadd.f32 %v1163_v13, %v109_v27  ;;  %v116_v27 = vadd.f32 %v1163_v13, %v1156_v10 }
 0x652   :  { %v319_v46 = vpop.permute.xlu0 %318 }
 0x653   :  { %v321_v47 = vadd.f32 %v319_v46, %v311_v43 }
 0x655   :  { %1004 = vtanh.f32 %v321_v47 }
 0x65b   :  { %v1005_v48 = vpop.eup %1004 }
 0x65c   :  { %324 = vrot.lane.b32.xlu1 %v1005_v48, %s1061_s3 }
 0x6ce   :  { %v325_v50 = vpop.permute.xlu1 %324 }
 0x6cf   :  { %v327_v51 = vmul.f32 %v325_v50, %v307_v38 }
 0x6d1   :  { %329 = vrot.lane.b32.xlu2 %v327_v51, %s1062_s19 }
 0x72b   :  { %v330_v52 = vpop.permute.xlu2 %329 }
 0x72c   :  { %949 = vmatmul.msk.f32.vlgmr.msra.gmra.mxu1 %vm137_vm5, %v330_v52 }
 0x72d   :  { %729 = vmatpush.msra.mxu1 %v1110_v3 }
 0x72f   :  { %730 = vmatpush.msra.mxu1 %v1119_v5 }
 0x731   :  { %731 = vmatpush.msra.mxu1 %v1126_v6 }
 0x733   :  { %732 = vmatpush.msra.mxu1 %v1134_v7 }
 0x7a9   :  { %v350_v55 = vpop.f32.mrf.mxu1 }
 0x7aa   :  { %v353_v56 = vadd.f32 %v350_v55, %v107_v54 }
 0x7ac   :  { %v950_v57 = vmul.f32 -1.442695, %v353_v56  ;;  %v30_v56 = vld [vmem:[%s1326_s0 + $0x28] sm:$0xff] }
 0x7ad   :  { %934 = vmatmul.msk.f32.gmra.mxu0 %vm43_vm0, %v30_v56 }
 0x7ae   :  { %1006 = vpow2.f32 %v950_v57 }
 0x7b4   :  { %v1007_v58 = vpop.eup %1006 }
 0x7b5   :  { %v357_v59 = vadd.f32 1.0, %v1007_v58 }
 0x7b7   :  { %1008 = vrcp.f32 %v357_v59  ;;  %v369_v63 = vand.u32 2147483648, %v357_v59  ;;  %v367_v1 = vand.u32 2147483647, %v357_v59  ;;  %vm363_vm15 = vweird.f32 %v357_v59 }
 0x7b9   :  { %v370_v4 = vor.u32 1.1754944e-38, %v369_v63  ;;  %vm368_vm2 = vcmp.eq.f32.partialorder %v367_v1, 8.507059e+37 }
 0x7bd   :  { %v1009_v60 = vpop.eup %1008 }
 0x7be   :  { %v359_v61 = vmul.f32 %v1009_v60, %v357_v59  ;;  %vm364_vm14 = vweird.f32 %v1009_v60 }
 0x7bf   :  { %vm365_vm1 = vmor %vm363_vm15, %vm364_vm14 }
 0x7c0   :  { %v360_v62 = vsub.f32 1.0, %v359_v61 }
 0x7c2   :  { %v361_v0 = vmul.f32 %v1009_v60, %v360_v62 }
 0x7c4   :  { %v362_v2 = vadd.f32 %v1009_v60, %v361_v0 }
 0x7c6   :  { %v366_v8 = vsel %vm365_vm1, %v1009_v60, %v362_v2 }
 0x7c7   :  { %v371_v9 = vsel %vm368_vm2, %v370_v4, %v366_v8 }
 0x7c8   :  { %v373_v12 = vmul.f32 2.0, %v371_v9  ;;  %v375_v17 = vmul.f32 %v371_v9, %v321_v47 }
 0x7ca   :  { %v951_v14 = vadd.f32 -1.0, %v373_v12 }
 0x7cc   :  { %377 = vrot.lane.b32.xlu0 %v951_v14, %s1061_s3 }
 0x82a   :  { %v112_v58 = vpop.f32.mrf.mxu0 }
 0x82b   :  { %v113_v59 = vadd.f32 %v1163_v13, %v112_v58 }
 0x83e   :  { %v378_v15 = vpop.permute.xlu0 %377 }
 0x83f   :  { %v380_v16 = vmul.f32 %v378_v15, %v371_v9 }
 0x841   :  { %382 = vrot.lane.b32.xlu1 %v380_v16, %s1061_s3 }
 0x8b3   :  { %v383_v18 = vpop.permute.xlu1 %382 }
 0x8b4   :  { %v385_v19 = vadd.f32 %v383_v18, %v375_v17 }
 0x8b6   :  { %1010 = vtanh.f32 %v385_v19 }
 0x8bc   :  { %v1011_v22 = vpop.eup %1010 }
 0x8bd   :  { %388 = vrot.lane.b32.xlu2 %v1011_v22, %s1061_s3 }
 0x917   :  { %v389_v23 = vpop.permute.xlu2 %388 }
 0x918   :  { %v391_v24 = vmul.f32 %v389_v23, %v371_v9 }
 0x91a   :  { %393 = vrot.lane.b32.xlu0 %v391_v24, %s1062_s19 }
 0x98c   :  { %v394_v26 = vpop.permute.xlu0 %393 }
 0x98d   :  { %952 = vmatmul.msk.f32.vlgmr.msra.gmra.mxu2 %vm137_vm5, %v394_v26 }
 0x98e   :  { %793 = vmatpush.msra.mxu2 %v1110_v3 }
 0x990   :  { %794 = vmatpush.msra.mxu2 %v1119_v5 }
 0x992   :  { %795 = vmatpush.msra.mxu2 %v1126_v6 }
 0x994   :  { %796 = vmatpush.msra.mxu2 %v1134_v7 }
 0xa10   :  { %v414_v29 = vpop.f32.mrf.mxu2 }
 0xa11   :  { %v417_v30 = vadd.f32 %v414_v29, %v110_v28 }
 0xa13   :  { %v953_v31 = vmul.f32 -1.442695, %v417_v30 }
 0xa15   :  { %1012 = vpow2.f32 %v953_v31 }
 0xa1b   :  { %v1013_v32 = vpop.eup %1012 }
 0xa1c   :  { %v421_v33 = vadd.f32 1.0, %v1013_v32 }
 0xa1e   :  { %1014 = vrcp.f32 %v421_v33  ;;  %v433_v37 = vand.u32 2147483648, %v421_v33  ;;  %v431_v39 = vand.u32 2147483647, %v421_v33  ;;  %vm427_vm4 = vweird.f32 %v421_v33 }
 0xa20   :  { %v434_v41 = vor.u32 1.1754944e-38, %v433_v37  ;;  %vm432_vm7 = vcmp.eq.f32.partialorder %v431_v39, 8.507059e+37 }
 0xa24   :  { %v1015_v34 = vpop.eup %1014 }
 0xa25   :  { %v423_v35 = vmul.f32 %v1015_v34, %v421_v33  ;;  %vm428_vm3 = vweird.f32 %v1015_v34 }
 0xa26   :  { %vm429_vm6 = vmor %vm427_vm4, %vm428_vm3 }
 0xa27   :  { %v424_v36 = vsub.f32 1.0, %v423_v35 }
 0xa29   :  { %v425_v38 = vmul.f32 %v1015_v34, %v424_v36 }
 0xa2b   :  { %v426_v40 = vadd.f32 %v1015_v34, %v425_v38 }
 0xa2d   :  { %v430_v42 = vsel %vm429_vm6, %v1015_v34, %v426_v40 }
 0xa2e   :  { %v435_v43 = vsel %vm432_vm7, %v434_v41, %v430_v42 }
 0xa2f   :  { %v437_v46 = vmul.f32 2.0, %v435_v43  ;;  %v439_v50 = vmul.f32 %v435_v43, %v385_v19 }
 0xa31   :  { %v954_v47 = vadd.f32 -1.0, %v437_v46 }
 0xa33   :  { %441 = vrot.lane.b32.xlu1 %v954_v47, %s1061_s3 }
 0xaa5   :  { %v442_v48 = vpop.permute.xlu1 %441 }
 0xaa6   :  { %v444_v49 = vmul.f32 %v442_v48, %v435_v43 }
 0xaa8   :  { %446 = vrot.lane.b32.xlu2 %v444_v49, %s1061_s3 }
 0xb02   :  { %v447_v51 = vpop.permute.xlu2 %446 }
 0xb03   :  { %v449_v52 = vadd.f32 %v447_v51, %v439_v50 }
 0xb05   :  { %1016 = vtanh.f32 %v449_v52 }
 0xb0b   :  { %v1017_v53 = vpop.eup %1016 }
 0xb0c   :  { %452 = vrot.lane.b32.xlu0 %v1017_v53, %s1061_s3 }
 0xb7e   :  { %v453_v54 = vpop.permute.xlu0 %452 }
 0xb7f   :  { %v455_v55 = vmul.f32 %v453_v54, %v435_v43 }
 0xb81   :  { %457 = vrot.lane.b32.xlu1 %v455_v55, %s1062_s19  ;;  %v119_v55 = vadd.f32 %v1163_v13, %v1158_v11 }
 0xbf3   :  { %v458_v57 = vpop.permute.xlu1 %457 }
 0xbf4   :  { %955 = vmatmul.msk.f32.vlgmr.msra.gmra.mxu3 %vm137_vm5, %v458_v57 }
 0xbf5   :  { %857 = vmatpush.msra.mxu3 %v1110_v3 }
 0xbf7   :  { %858 = vmatpush.msra.mxu3 %v1119_v5 }
 0xbf9   :  { %859 = vmatpush.msra.mxu3 %v1126_v6 }
 0xbfb   :  { %860 = vmatpush.msra.mxu3 %v1134_v7 }
 0xc77   :  { %v478_v60 = vpop.f32.mrf.mxu3 }
 0xc78   :  { %v481_v61 = vadd.f32 %v478_v60, %v113_v59 }
 0xc7a   :  { %v956_v62 = vmul.f32 -1.442695, %v481_v61 }
 0xc7c   :  { %1018 = vpow2.f32 %v956_v62 }
 0xc82   :  { %v1019_v63 = vpop.eup %1018 }
 0xc83   :  { %v485_v0 = vadd.f32 1.0, %v1019_v63 }
 0xc85   :  { %1020 = vrcp.f32 %v485_v0  ;;  %v497_v3 = vand.u32 2147483648, %v485_v0  ;;  %v495_v5 = vand.u32 2147483647, %v485_v0  ;;  %vm491_vm8 = vweird.f32 %v485_v0 }
 0xc87   :  { %v498_v7 = vor.u32 1.1754944e-38, %v497_v3  ;;  %vm496_vm10 = vcmp.eq.f32.partialorder %v495_v5, 8.507059e+37 }
 0xc8b   :  { %v1021_v1 = vpop.eup %1020 }
 0xc8c   :  { %v487_v2 = vmul.f32 %v1021_v1, %v485_v0  ;;  %vm492_vm0 = vweird.f32 %v1021_v1 }
 0xc8d   :  { %vm493_vm9 = vmor %vm491_vm8, %vm492_vm0 }
 0xc8e   :  { %v488_v4 = vsub.f32 1.0, %v487_v2 }
 0xc90   :  { %v489_v8 = vmul.f32 %v1021_v1, %v488_v4 }
 0xc92   :  { %v490_v6 = vadd.f32 %v1021_v1, %v489_v8 }
 0xc94   :  { %v494_v9 = vsel %vm493_vm9, %v1021_v1, %v490_v6 }
 0xc95   :  { %v499_v12 = vsel %vm496_vm10, %v498_v7, %v494_v9 }
 0xc96   :  { %v501_v14 = vmul.f32 2.0, %v499_v12  ;;  %v503_v18 = vmul.f32 %v499_v12, %v449_v52 }
 0xc98   :  { %v957_v15 = vadd.f32 -1.0, %v501_v14 }
 0xc9a   :  { %505 = vrot.lane.b32.xlu2 %v957_v15, %s1061_s3 }
 0xcf4   :  { %v506_v16 = vpop.permute.xlu2 %505 }
 0xcf5   :  { %v508_v17 = vmul.f32 %v506_v16, %v499_v12 }
 0xcf7   :  { %510 = vrot.lane.b32.xlu0 %v508_v17, %s1061_s3 }
 0xd69   :  { %v511_v19 = vpop.permute.xlu0 %510 }
 0xd6a   :  { %v513_v22 = vadd.f32 %v511_v19, %v503_v18 }
 0xd6c   :  { %1022 = vtanh.f32 %v513_v22 }
 0xd72   :  { %v1023_v23 = vpop.eup %1022 }
 0xd73   :  { %516 = vrot.lane.b32.xlu1 %v1023_v23, %s1061_s3 }
 0xde5   :  { %v517_v24 = vpop.permute.xlu1 %516 }
 0xde6   :  { %v519_v25 = vmul.f32 %v517_v24, %v499_v12 }
 0xde8   :  { %521 = vrot.lane.b32.xlu2 %v519_v25, %s1062_s19 }
 0xe42   :  { %v522_v26 = vpop.permute.xlu2 %521 }
 0xe43   :  { %958 = vmatmul.msk.f32.vlgmr.msrb.gmra.mxu1 %vm137_vm5, %v522_v26 }
 0xec0   :  { %v542_v28 = vpop.f32.mrf.mxu1 }
 0xec1   :  { %v545_v29 = vadd.f32 %v542_v28, %v116_v27 }
 0xec3   :  { %v959_v30 = vmul.f32 -1.442695, %v545_v29 }
 0xec5   :  { %1024 = vpow2.f32 %v959_v30 }
 0xecb   :  { %v1025_v31 = vpop.eup %1024 }
 0xecc   :  { %v549_v32 = vadd.f32 1.0, %v1025_v31 }
 0xece   :  { %1026 = vrcp.f32 %v549_v32  ;;  %v561_v36 = vand.u32 2147483648, %v549_v32  ;;  %v559_v38 = vand.u32 2147483647, %v549_v32  ;;  %vm555_vm12 = vweird.f32 %v549_v32 }
 0xed0   :  { %v562_v40 = vor.u32 1.1754944e-38, %v561_v36  ;;  %vm560_vm14 = vcmp.eq.f32.partialorder %v559_v38, 8.507059e+37 }
 0xed4   :  { %v1027_v33 = vpop.eup %1026 }
 0xed5   :  { %v551_v34 = vmul.f32 %v1027_v33, %v549_v32  ;;  %vm556_vm11 = vweird.f32 %v1027_v33 }
 0xed6   :  { %vm557_vm13 = vmor %vm555_vm12, %vm556_vm11 }
 0xed7   :  { %v552_v35 = vsub.f32 1.0, %v551_v34 }
 0xed9   :  { %v553_v37 = vmul.f32 %v1027_v33, %v552_v35 }
 0xedb   :  { %v554_v39 = vadd.f32 %v1027_v33, %v553_v37 }
 0xedd   :  { %v558_v41 = vsel %vm557_vm13, %v1027_v33, %v554_v39 }
 0xede   :  { %v563_v10 = vsel %vm560_vm14, %v562_v40, %v558_v41 }
 0xedf   :  { %v565_v42 = vmul.f32 2.0, %v563_v10  ;;  %v567_v48 = vmul.f32 %v563_v10, %v513_v22  ;;  %v122_v22 = vadd.f32 %v1163_v13, %v1191_v44 }
 0xee1   :  { %v960_v43 = vadd.f32 -1.0, %v565_v42 }
 0xee3   :  { %569 = vrot.lane.b32.xlu0 %v960_v43, %s1061_s3 }
 0xf55   :  { %v570_v46 = vpop.permute.xlu0 %569 }
 0xf56   :  { %v572_v47 = vmul.f32 %v570_v46, %v563_v10 }
 0xf58   :  { %574 = vrot.lane.b32.xlu1 %v572_v47, %s1061_s3 }
 0xfca   :  { %v575_v49 = vpop.permute.xlu1 %574 }
 0xfcb   :  { %v577_v50 = vadd.f32 %v575_v49, %v567_v48  ;;  %v125_v49 = vadd.f32 %v1163_v13, %v1193_v45 }
 0xfcd   :  { %1028 = vtanh.f32 %v577_v50 }
 0xfd3   :  { %v1029_v51 = vpop.eup %1028 }
 0xfd4   :  { %580 = vrot.lane.b32.xlu2 %v1029_v51, %s1061_s3 }
0x102e   :  { %v581_v52 = vpop.permute.xlu2 %580 }
0x102f   :  { %v583_v53 = vmul.f32 %v581_v52, %v563_v10 }
0x1031   :  { %585 = vrot.lane.b32.xlu0 %v583_v53, %s1062_s19 }
0x10a3   :  { %v586_v54 = vpop.permute.xlu0 %585 }
0x10a4   :  { %961 = vmatmul.msk.f32.vlgmr.msrb.gmra.mxu2 %vm137_vm5, %v586_v54 }
0x1127   :  { %v606_v56 = vpop.f32.mrf.mxu2 }
0x1128   :  { %v609_v57 = vadd.f32 %v606_v56, %v119_v55 }
0x112a   :  { %v962_v58 = vmul.f32 -1.442695, %v609_v57 }
0x112c   :  { %1030 = vpow2.f32 %v962_v58 }
0x1132   :  { %v1031_v59 = vpop.eup %1030 }
0x1133   :  { %v613_v60 = vadd.f32 1.0, %v1031_v59 }
0x1135   :  { %1032 = vrcp.f32 %v613_v60  ;;  %v625_v0 = vand.u32 2147483648, %v613_v60  ;;  %v623_v2 = vand.u32 2147483647, %v613_v60  ;;  %vm619_vm1 = vweird.f32 %v613_v60 }
0x1137   :  { %v626_v3 = vor.u32 1.1754944e-38, %v625_v0  ;;  %vm624_vm3 = vcmp.eq.f32.partialorder %v623_v2, 8.507059e+37 }
0x113b   :  { %v1033_v61 = vpop.eup %1032 }
0x113c   :  { %v615_v62 = vmul.f32 %v1033_v61, %v613_v60  ;;  %vm620_vm15 = vweird.f32 %v1033_v61 }
0x113d   :  { %vm621_vm2 = vmor %vm619_vm1, %vm620_vm15 }
0x113e   :  { %v616_v63 = vsub.f32 1.0, %v615_v62 }
0x1140   :  { %v617_v1 = vmul.f32 %v1033_v61, %v616_v63 }
0x1142   :  { %v618_v4 = vadd.f32 %v1033_v61, %v617_v1 }
0x1144   :  { %v622_v8 = vsel %vm621_vm2, %v1033_v61, %v618_v4 }
0x1145   :  { %v627_v11 = vsel %vm624_vm3, %v626_v3, %v622_v8 }
0x1146   :  { %v629_v5 = vmul.f32 2.0, %v627_v11  ;;  %v631_v12 = vmul.f32 %v627_v11, %v577_v50 }
0x1148   :  { %v963_v6 = vadd.f32 -1.0, %v629_v5 }
0x114a   :  { %633 = vrot.lane.b32.xlu1 %v963_v6, %s1061_s3 }
0x11bc   :  { %v634_v7 = vpop.permute.xlu1 %633 }
0x11bd   :  { %v636_v9 = vmul.f32 %v634_v7, %v627_v11 }
0x11bf   :  { %638 = vrot.lane.b32.xlu2 %v636_v9, %s1061_s3 }
0x1219   :  { %v639_v14 = vpop.permute.xlu2 %638 }
0x121a   :  { %v641_v15 = vadd.f32 %v639_v14, %v631_v12  ;;  %v128_v12 = vadd.f32 %v1163_v13, %v1221_v20 }
0x121c   :  { %1034 = vtanh.f32 %v641_v15 }
0x1222   :  { %v1035_v16 = vpop.eup %1034 }
0x1223   :  { %644 = vrot.lane.b32.xlu0 %v1035_v16, %s1061_s3 }
0x1295   :  { %v645_v17 = vpop.permute.xlu0 %644 }
0x1296   :  { %v647_v18 = vmul.f32 %v645_v17, %v627_v11 }
0x1298   :  { %649 = vrot.lane.b32.xlu1 %v647_v18, %s1062_s19 }
0x130a   :  { %v650_v19 = vpop.permute.xlu1 %649 }
0x130b   :  { %964 = vmatmul.msk.f32.vlgmr.msrb.gmra.mxu3 %vm137_vm5, %v650_v19 }
0x138e   :  { %v670_v23 = vpop.f32.mrf.mxu3 }
0x138f   :  { %v673_v24 = vadd.f32 %v670_v23, %v122_v22 }
0x1391   :  { %v965_v25 = vmul.f32 -1.442695, %v673_v24 }
0x1393   :  { %1036 = vpow2.f32 %v965_v25 }
0x1399   :  { %v1037_v26 = vpop.eup %1036 }
0x139a   :  { %v677_v27 = vadd.f32 1.0, %v1037_v26 }
0x139c   :  { %1038 = vrcp.f32 %v677_v27  ;;  %v689_v31 = vand.u32 2147483648, %v677_v27  ;;  %v687_v33 = vand.u32 2147483647, %v677_v27  ;;  %vm683_vm6 = vweird.f32 %v677_v27 }
0x139e   :  { %v690_v35 = vor.u32 1.1754944e-38, %v689_v31  ;;  %vm688_vm0 = vcmp.eq.f32.partialorder %v687_v33, 8.507059e+37 }
0x13a2   :  { %v1039_v28 = vpop.eup %1038 }
0x13a3   :  { %v679_v29 = vmul.f32 %v1039_v28, %v677_v27  ;;  %vm684_vm4 = vweird.f32 %v1039_v28 }
0x13a4   :  { %vm685_vm7 = vmor %vm683_vm6, %vm684_vm4  ;;  %vm923_vm6 = vcmask 7168  }
0x13a5   :  { %v680_v30 = vsub.f32 1.0, %v679_v29 }
0x13a7   :  { %v681_v32 = vmul.f32 %v1039_v28, %v680_v30 }
0x13a9   :  { %v682_v34 = vadd.f32 %v1039_v28, %v681_v32 }
0x13ab   :  { %v686_v36 = vsel %vm685_vm7, %v1039_v28, %v682_v34 }
0x13ac   :  { %v691_v44 = vsel %vm688_vm0, %v690_v35, %v686_v36 }
0x13ad   :  { %v693_v37 = vmul.f32 2.0, %v691_v44  ;;  %v695_v41 = vmul.f32 %v691_v44, %v641_v15 }
0x13af   :  { %v966_v38 = vadd.f32 -1.0, %v693_v37 }
0x13b1   :  { %697 = vrot.lane.b32.xlu2 %v966_v38, %s1061_s3 }
0x140b   :  { %v698_v39 = vpop.permute.xlu2 %697 }
0x140c   :  { %v700_v40 = vmul.f32 %v698_v39, %v691_v44 }
0x140e   :  { %702 = vrot.lane.b32.xlu0 %v700_v40, %s1061_s3  ;;  %v131_v40 = vadd.f32 %v1163_v13, %v1223_v21 }
0x1480   :  { %v703_v10 = vpop.permute.xlu0 %702 }
0x1481   :  { %v705_v42 = vadd.f32 %v703_v10, %v695_v41 }
0x1483   :  { %1040 = vtanh.f32 %v705_v42 }
0x1489   :  { %v1041_v43 = vpop.eup %1040 }
0x148a   :  { %708 = vrot.lane.b32.xlu1 %v1041_v43, %s1061_s3 }
0x14fc   :  { %v709_v46 = vpop.permute.xlu1 %708 }
0x14fd   :  { %v711_v47 = vmul.f32 %v709_v46, %v691_v44 }
0x14ff   :  { %713 = vrot.lane.b32.xlu2 %v711_v47, %s1062_s19 }
0x1559   :  { %v714_v48 = vpop.permute.xlu2 %713 }
0x155a   :  { %967 = vmatmul.msk.f32.vlgmr.msra.gmra.mxu1 %vm137_vm5, %v714_v48 }
0x15d7   :  { %v734_v50 = vpop.f32.mrf.mxu1 }
0x15d8   :  { %v737_v51 = vadd.f32 %v734_v50, %v125_v49 }
0x15da   :  { %v968_v52 = vmul.f32 -1.442695, %v737_v51 }
0x15dc   :  { %1042 = vpow2.f32 %v968_v52 }
0x15e2   :  { %v1043_v53 = vpop.eup %1042 }
0x15e3   :  { %v741_v54 = vadd.f32 1.0, %v1043_v53 }
0x15e5   :  { %1044 = vrcp.f32 %v741_v54  ;;  %v753_v58 = vand.u32 2147483648, %v741_v54  ;;  %v751_v60 = vand.u32 2147483647, %v741_v54  ;;  %vm747_vm9 = vweird.f32 %v741_v54 }
0x15e7   :  { %v754_v62 = vor.u32 1.1754944e-38, %v753_v58  ;;  %vm752_vm11 = vcmp.eq.f32.partialorder %v751_v60, 8.507059e+37 }
0x15eb   :  { %v1045_v55 = vpop.eup %1044 }
0x15ec   :  { %v743_v56 = vmul.f32 %v1045_v55, %v741_v54  ;;  %vm748_vm8 = vweird.f32 %v1045_v55 }
0x15ed   :  { %vm749_vm10 = vmor %vm747_vm9, %vm748_vm8 }
0x15ee   :  { %v744_v57 = vsub.f32 1.0, %v743_v56 }
0x15f0   :  { %v745_v59 = vmul.f32 %v1045_v55, %v744_v57 }
0x15f2   :  { %v746_v61 = vadd.f32 %v1045_v55, %v745_v59  ;;  %v986_v59 = vld [vmem:[%s1329_s4] ss:$0 sm:$0xff] }
0x15f4   :  { %v750_v63 = vsel %vm749_vm10, %v1045_v55, %v746_v61 }
0x15f5   :  { %v755_v45 = vsel %vm752_vm11, %v754_v62, %v750_v63 }
0x15f6   :  { %v757_v0 = vmul.f32 2.0, %v755_v45  ;;  %v759_v3 = vmul.f32 %v755_v45, %v705_v42 }
0x15f8   :  { %v969_v1 = vadd.f32 -1.0, %v757_v0 }
0x15fa   :  { %761 = vrot.lane.b32.xlu0 %v969_v1, %s1061_s3 }
0x166c   :  { %v762_v2 = vpop.permute.xlu0 %761 }
0x166d   :  { %v764_v4 = vmul.f32 %v762_v2, %v755_v45 }
0x166f   :  { %766 = vrot.lane.b32.xlu1 %v764_v4, %s1061_s3  ;;  %v11_v4 = vstv %s1330_s5 }
0x1670   :  { %12 = vst [vmem:[#allocation2] sm:$0x1] %v11_v4 }
0x16e1   :  { %v767_v8 = vpop.permute.xlu1 %766 }
0x16e2   :  { %v769_v11 = vadd.f32 %v767_v8, %v759_v3 }
0x16e4   :  { %1046 = vtanh.f32 %v769_v11 }
0x16ea   :  { %v1047_v5 = vpop.eup %1046 }
0x16eb   :  { %772 = vrot.lane.b32.xlu2 %v1047_v5, %s1061_s3 }
0x1745   :  { %v773_v6 = vpop.permute.xlu2 %772 }
0x1746   :  { %v775_v7 = vmul.f32 %v773_v6, %v755_v45 }
0x1748   :  { %777 = vrot.lane.b32.xlu0 %v775_v7, %s1062_s19 }
0x17ba   :  { %v778_v9 = vpop.permute.xlu0 %777 }
0x17bb   :  { %970 = vmatmul.msk.f32.vlgmr.msra.gmra.mxu2 %vm137_vm5, %v778_v9 }
0x183e   :  { %v798_v14 = vpop.f32.mrf.mxu2 }
0x183f   :  { %v801_v15 = vadd.f32 %v798_v14, %v128_v12 }
0x1841   :  { %v971_v16 = vmul.f32 -1.442695, %v801_v15 }
0x1843   :  { %1048 = vpow2.f32 %v971_v16 }
0x1849   :  { %v1049_v17 = vpop.eup %1048 }
0x184a   :  { %v805_v18 = vadd.f32 1.0, %v1049_v17 }
0x184c   :  { %1050 = vrcp.f32 %v805_v18  ;;  %v817_v24 = vand.u32 2147483648, %v805_v18  ;;  %v815_v26 = vand.u32 2147483647, %v805_v18  ;;  %vm811_vm13 = vweird.f32 %v805_v18 }
0x184e   :  { %v818_v28 = vor.u32 1.1754944e-38, %v817_v24  ;;  %vm816_vm15 = vcmp.eq.f32.partialorder %v815_v26, 8.507059e+37 }
0x1852   :  { %v1051_v19 = vpop.eup %1050 }
0x1853   :  { %v807_v22 = vmul.f32 %v1051_v19, %v805_v18  ;;  %vm812_vm12 = vweird.f32 %v1051_v19 }
0x1854   :  { %vm813_vm14 = vmor %vm811_vm13, %vm812_vm12 }
0x1855   :  { %v808_v23 = vsub.f32 1.0, %v807_v22 }
0x1857   :  { %v809_v25 = vmul.f32 %v1051_v19, %v808_v23 }
0x1859   :  { %v810_v27 = vadd.f32 %v1051_v19, %v809_v25 }
0x185b   :  { %v814_v29 = vsel %vm813_vm14, %v1051_v19, %v810_v27 }
0x185c   :  { %v819_v20 = vsel %vm816_vm15, %v818_v28, %v814_v29 }
0x185d   :  { %v821_v30 = vmul.f32 2.0, %v819_v20  ;;  %v823_v34 = vmul.f32 %v819_v20, %v769_v11  ;;  %v987_v11 = vld [vmem:[#allocation2] ss:$0 sm:$0xff] }
0x185f   :  { %v972_v31 = vadd.f32 -1.0, %v821_v30 }
0x1861   :  { %825 = vrot.lane.b32.xlu1 %v972_v31, %s1061_s3 }
0x18d3   :  { %v826_v32 = vpop.permute.xlu1 %825 }
0x18d4   :  { %v828_v33 = vmul.f32 %v826_v32, %v819_v20 }
0x18d6   :  { %830 = vrot.lane.b32.xlu2 %v828_v33, %s1061_s3 }
0x1930   :  { %v831_v35 = vpop.permute.xlu2 %830 }
0x1931   :  { %v833_v36 = vadd.f32 %v831_v35, %v823_v34 }
0x1933   :  { %1052 = vtanh.f32 %v833_v36 }
0x1939   :  { %v1053_v44 = vpop.eup %1052 }
0x193a   :  { %836 = vrot.lane.b32.xlu0 %v1053_v44, %s1061_s3 }
0x19ac   :  { %v837_v37 = vpop.permute.xlu0 %836 }
0x19ad   :  { %v839_v38 = vmul.f32 %v837_v37, %v819_v20 }
0x19af   :  { %841 = vrot.lane.b32.xlu1 %v839_v38, %s1062_s19 }
0x1a21   :  { %v842_v39 = vpop.permute.xlu1 %841 }
0x1a22   :  { %973 = vmatmul.msk.f32.vlgmr.msra.gmra.mxu3 %vm137_vm5, %v842_v39 }
0x1aa5   :  { %v862_v41 = vpop.f32.mrf.mxu3 }
0x1aa6   :  { %v865_v10 = vadd.f32 %v862_v41, %v131_v40 }
0x1aa8   :  { %v974_v42 = vmul.f32 -1.442695, %v865_v10 }
0x1aaa   :  { %1054 = vpow2.f32 %v974_v42 }
0x1ab0   :  { %v1055_v43 = vpop.eup %1054 }
0x1ab1   :  { %v869_v46 = vadd.f32 1.0, %v1055_v43 }
0x1ab3   :  { %1056 = vrcp.f32 %v869_v46  ;;  %v881_v50 = vand.u32 2147483648, %v869_v46  ;;  %v879_v52 = vand.u32 2147483647, %v869_v46  ;;  %vm875_vm2 = vweird.f32 %v869_v46 }
0x1ab5   :  { %v882_v54 = vor.u32 1.1754944e-38, %v881_v50  ;;  %vm880_vm4 = vcmp.eq.f32.partialorder %v879_v52, 8.507059e+37 }
0x1ab9   :  { %v1057_v47 = vpop.eup %1056 }
0x1aba   :  { %v871_v48 = vmul.f32 %v1057_v47, %v869_v46  ;;  %vm876_vm1 = vweird.f32 %v1057_v47 }
0x1abb   :  { %vm877_vm3 = vmor %vm875_vm2, %vm876_vm1 }
0x1abc   :  { %v872_v49 = vsub.f32 1.0, %v871_v48 }
0x1abe   :  { %v873_v51 = vmul.f32 %v1057_v47, %v872_v49 }
0x1ac0   :  { %v874_v53 = vadd.f32 %v1057_v47, %v873_v51 }
0x1ac2   :  { %v878_v55 = vsel %vm877_vm3, %v1057_v47, %v874_v53 }
0x1ac3   :  { %v883_v13 = vsel %vm880_vm4, %v882_v54, %v878_v55 }
0x1ac4   :  { %v885_v21 = vmul.f32 2.0, %v883_v13  ;;  %v887_v60 = vmul.f32 %v883_v13, %v833_v36 }
0x1ac6   :  { %v975_v56 = vadd.f32 -1.0, %v885_v21 }
0x1ac8   :  { %889 = vrot.lane.b32.xlu2 %v975_v56, %s1061_s3 }
0x1ad0   :  { %907 = vrot.lane.b32.xlu2 %v986_v59, %s1062_s19 }
0x1b22   :  { %v890_v57 = vpop.permute.xlu2 %889 }
0x1b23   :  { %v892_v58 = vmul.f32 %v890_v57, %v883_v13 }
0x1b25   :  { %894 = vrot.lane.b32.xlu0 %v892_v58, %s1061_s3 }
0x1b2a   :  { %v908_v0 = vpop.permute.xlu2 %907 }
0x1b97   :  { %v895_v61 = vpop.permute.xlu0 %894 }
0x1b98   :  { %v897_v62 = vadd.f32 %v895_v61, %v887_v60 }
0x1b9a   :  { %1058 = vtanh.f32 %v897_v62 }
0x1ba0   :  { %v1059_v63 = vpop.eup %1058 }
0x1ba1   :  { %900 = vrot.lane.b32.xlu1 %v1059_v63, %s1061_s3 }
0x1c13   :  { %v901_v45 = vpop.permute.xlu1 %900 }
0x1c14   :  { %v903_v1 = vmul.f32 %v901_v45, %v883_v13 }
0x1c16   :  { %v910_v2 = vmul.f32 %v908_v0, %v903_v1 }
0x1c18   :  { %912 = vrot.lane.b32.xlu0 %v910_v2, %s1062_s19 }
0x1c8a   :  { %v913_v3 = vpop.permute.xlu0 %912 }
0x1c8b   :  { %v915_v8 = vsel %vm137_vm5, %v913_v3, 0.0 }
0x1c8c   :  { %916 = vadd.xlane.f32.xlu1 %v915_v8 }
0x1cff   :  { %v917_v5 = vpop.xlane.xlu1 %916 }
0x1d00   :  { %v922_v6 = vadd.f32 %v987_v11, %v917_v5 }
0x1d02   :  { %924 = vst.msk [vmem:[%s1331_s6] sm:$0xff] %vm923_vm6, %v922_v6 }

</bundles_post_ra>
